<compile_context>
chip_gen: v7x
topology: tpu7x:2x2x1
jax: 0.10.0
libtpu: 0.0.40
codegen_flags: <defaults>
</compile_context>

<pallas_src>
import jax
import jax.numpy as jnp
from jax import lax
from jax.experimental import pallas as pl
from jax.experimental.pallas import tpu as pltpu


_LANE = 128
_SUBLANE = 8


def _round_up(v, m):
    return ((v + m - 1) // m) * m


def _choose_block_m(n, max_block_m):
    """Row-tile size: multiple of 8, <= max_block_m, and (when possible)
    producing >= 2 grid steps so v7x's two TensorCores both get work."""
    n8 = _round_up(max(n, 1), _SUBLANE)
    if n8 <= _SUBLANE:
        return _SUBLANE
    half = _round_up((n8 + 1) // 2, _SUBLANE)
    return min(max_block_m, half)


def cnn_encoder_kernel(x_ref, w_ref, b_ref, o_ref):
    """One (block_m, K) row-tile of the full-extent conv-as-matmul + epilogue.

    x_ref: (block_m, K)        f32 -- flattened input rows (no wrapper cast)
    w_ref: (cout_pad, K)       f32 -- pre-baked padded weight, (Cout, K) layout
    b_ref: (1, cout_pad)       f32 -- pre-baked padded bias
    o_ref: (block_m, Cout)     f32 -- UN-padded output (Cout == full last dim)
    """
    cout = o_ref.shape[1]
    x = x_ref[...]
    w = w_ref[...]
    # Contract the shared last dim: (block_m, K) . (cout_pad, K)^T on the MXU,
    # f32 operands, f32 accumulation -> matches the f32 PyTorch module.
    y = lax.dot_general(
        x, w,
        dimension_numbers=(((1,), (1,)), ((), ())),
        preferred_element_type=jnp.float32,
    )
    y = y + b_ref[...]
    # Fused epilogue:  relu(y * (y < 1.5))  ==  y if 0 < y < 1.5 else 0
    y = jnp.where((y > 0.0) & (y < 1.5), y, 0.0)
    # Store only the real Cout columns (unmasked-vs-masked store cost is
    # negligible here; output HBM traffic drops 32x vs a 128-padded tile).
    o_ref[...] = y[:, :cout]


def prepare_cnn_encoder_params(weight, bias):
    """Pre-bake (once, at parameter-init time) the padded f32 weight/bias so the
    per-call forward has no pad/cast XLA passes.

    weight: (Cout, Cin, H, W); bias: (Cout,).
    Returns w_pad: (cout_pad, K) f32, b_pad: (1, cout_pad) f32.
    """
    cout, cin, h, w = weight.shape
    k = cin * h * w
    cout_pad = _round_up(max(cout, _LANE), _LANE)
    w_pad = jnp.zeros((cout_pad, k), jnp.float32)
    w_pad = w_pad.at[:cout].set(weight.reshape(cout, k).astype(jnp.float32))
    b_pad = jnp.zeros((1, cout_pad), jnp.float32)
    b_pad = b_pad.at[0, :cout].set(bias.astype(jnp.float32))
    return w_pad, b_pad


def cnn_encoder_forward(x, w_pad, b_pad, cout, *, max_block_m=512):
    """CNNEncoder forward.

    x: (N, C, H, W) f32;  w_pad/b_pad: from prepare_cnn_encoder_params;
    cout: real number of output channels.  Returns (N, cout, 1, 1) f32.
    """
    n, c, h, w = x.shape
    k = c * h * w
    cout_pad = w_pad.shape[0]
    assert w_pad.shape == (cout_pad, k)
    assert b_pad.shape == (1, cout_pad)

    x_flat = x.reshape(n, k)                       # contiguous reshape, stays f32
    block_m = _choose_block_m(n, max_block_m)
    n_pad = _round_up(n, block_m)
    if n_pad != n:
        # Only needed when N is not a multiple of block_m (trivial at small N).
        x_flat = jnp.pad(x_flat, ((0, n_pad - n), (0, 0)))

    grid = (n_pad // block_m,)

    out = pl.pallas_call(
        cnn_encoder_kernel,
        out_shape=jax.ShapeDtypeStruct((n_pad, cout), jnp.float32),
        grid_spec=pltpu.PrefetchScalarGridSpec(
            num_scalar_prefetch=0,
            grid=grid,
            in_specs=[
                pl.BlockSpec((block_m, k), lambda i: (i, 0)),
                pl.BlockSpec((cout_pad, k), lambda i: (0, 0)),   # grid-invariant
                pl.BlockSpec((1, cout_pad), lambda i: (0, 0)),   # grid-invariant
            ],
            out_specs=pl.BlockSpec((block_m, cout), lambda i: (i, 0)),
        ),
        compiler_params=pltpu.CompilerParams(
            # Independent row tiles -> shards across the 2 TensorCores on v7x;
            # harmless on single-TC v5e/v6e.
            dimension_semantics=("parallel",),
            # Safe on v5e/v6e (128 MiB) and v7x (64 MiB); tiles use ~5.5 MiB.
            vmem_limit_bytes=32 * 1024 * 1024,
        ),
    )(x_flat, w_pad, b_pad)

    if n_pad != n:
        out = out[:n]
    # nn.Conv2d with kernel (H, W) on an (H, W) input -> spatial 1x1, NCHW output.
    return out.reshape(n, cout, 1, 1)


if __name__ == "__main__":
    # Small shapes consistent with the module: channels=4, H=W=16, batch=2
    batch, channels, H, W = 2, 4, 16, 16

    key = jax.random.PRNGKey(0)
    kx, kw, kb = jax.random.split(key, 3)

    x = jax.random.normal(kx, (batch, channels, H, W), dtype=jnp.float32)

    # Deterministic parameter init (mimicking Conv2d's uniform fan-in init)
    fan_in = channels * H * W
    bound = 1.0 / (fan_in ** 0.5)
    weight = jax.random.uniform(
        kw, (channels, channels, H, W), minval=-bound, maxval=bound,
        dtype=jnp.float32)
    bias = jax.random.uniform(
        kb, (channels,), minval=-bound, maxval=bound, dtype=jnp.float32)

    # Pre-bake padded params once (parameter-init time), then run the forward.
    w_pad, b_pad = prepare_cnn_encoder_params(weight, bias)
    out = cnn_encoder_forward(x, w_pad, b_pad, channels)
    out = jax.block_until_ready(out)
    assert out.shape == (batch, channels, 1, 1)

    # f32 reference matching the PyTorch module's semantics.
    y = jnp.dot(x.reshape(batch, -1), weight.reshape(channels, -1).T,
                precision=jax.lax.Precision.HIGHEST) + bias
    y = y * (y < 1.5).astype(jnp.float32)
    ref = jnp.maximum(y, 0.0).reshape(batch, channels, 1, 1)

    # Tolerance covers any difference in f32-matmul pass strategy between the
    # Mosaic kernel and the XLA HIGHEST-precision reference.
    assert jnp.allclose(out, ref, atol=1e-3, rtol=1e-3), (out, ref)

    print("KERNEL_OK")
</pallas_src>

<mosaic_0001>
module attributes {stable_mosaic.version = 11 : i64} {
  func.func @cnn_encoder_kernel(%arg0: i32, %arg1: memref<8x1024xf32, #tpu.memory_space<vmem>>, %arg2: memref<128x1024xf32, #tpu.memory_space<vmem>>, %arg3: memref<1x128xf32, #tpu.memory_space<vmem>>, %arg4: memref<8x4xf32, #tpu.memory_space<vmem>>) attributes {dimension_semantics = [#tpu.dimension_semantics<parallel>], iteration_bounds = array<i64: 1>, scalar_prefetch = 0 : i64, scratch_operands = 0 : i64, tpu.core_type = #tpu.core_type<tc>, window_params = [{transform_indices = @transform_0, window_bounds = array<i64: 8, 1024>}, {pipeline_mode = #tpu.pipeline_mode<synchronous>, transform_indices = @transform_1, window_bounds = array<i64: 128, 1024>}, {pipeline_mode = #tpu.pipeline_mode<synchronous>, transform_indices = @transform_2, window_bounds = array<i64: 1, 128>}, {transform_indices = @transform_3, window_bounds = array<i64: 8, 4>}]} {
    %c0 = arith.constant 0 : index
    %c0_0 = arith.constant 0 : index
    %0 = vector.load %arg1[%c0, %c0_0] : memref<8x1024xf32, #tpu.memory_space<vmem>>, vector<8x1024xf32>
    %c0_1 = arith.constant 0 : index
    %c0_2 = arith.constant 0 : index
    %1 = vector.load %arg2[%c0_1, %c0_2] : memref<128x1024xf32, #tpu.memory_space<vmem>>, vector<128x1024xf32>
    %cst = arith.constant dense<0.000000e+00> : vector<8x128xf32>
    %2 = tpu.matmul %0, %1, %cst {dimension_numbers = #tpu.dot_dimension_numbers<[1], [1], [0], [0], [0, 0, 1, 0], [], []>} : vector<8x1024xf32>, vector<128x1024xf32>, vector<8x128xf32> -> vector<8x128xf32>
    %c0_3 = arith.constant 0 : index
    %c0_4 = arith.constant 0 : index
    %3 = vector.load %arg3[%c0_3, %c0_4] : memref<1x128xf32, #tpu.memory_space<vmem>>, vector<1x128xf32>
    %4 = vector.broadcast %3 : vector<1x128xf32> to vector<8x128xf32>
    %5 = arith.addf %2, %4 : vector<8x128xf32>
    %cst_5 = arith.constant 0.000000e+00 : f32
    %6 = vector.broadcast %cst_5 : f32 to vector<8x128xf32>
    %7 = arith.cmpf ogt, %5, %6 : vector<8x128xf32>
    %cst_6 = arith.constant 1.500000e+00 : f32
    %8 = vector.broadcast %cst_6 : f32 to vector<8x128xf32>
    %9 = arith.cmpf olt, %5, %8 : vector<8x128xf32>
    %10 = arith.andi %7, %9 : vector<8x128xi1>
    %cst_7 = arith.constant 0.000000e+00 : f32
    %11 = vector.broadcast %cst_7 : f32 to vector<8x128xf32>
    %12 = arith.select %10, %5, %11 : vector<8x128xi1>, vector<8x128xf32>
    %13 = vector.extract_strided_slice %12 {offsets = [0, 0], sizes = [8, 4], strides = [1, 1]} : vector<8x128xf32> to vector<8x4xf32>
    %c0_8 = arith.constant 0 : index
    %c0_9 = arith.constant 0 : index
    %14 = vector.load %arg4[%c0_8, %c0_9] : memref<8x4xf32, #tpu.memory_space<vmem>>, vector<8x4xf32>
    tpu.vector_store %arg4[%c0_8, %c0_9], %13 {strides = array<i32>} : memref<8x4xf32, #tpu.memory_space<vmem>>, vector<8x4xf32>,
    return
  }
  func.func @transform_0(%arg0: i32) -> (i32, i32) {
    %c0_i32 = arith.constant 0 : i32
    %c0_i32_0 = arith.constant 0 : i32
    return %arg0, %c0_i32 : i32, i32
  }
  func.func @transform_1(%arg0: i32) -> (i32, i32) {
    %c0_i32 = arith.constant 0 : i32
    %c0_i32_0 = arith.constant 0 : i32
    %c0_i32_1 = arith.constant 0 : i32
    return %c0_i32, %c0_i32_0 : i32, i32
  }
  func.func @transform_2(%arg0: i32) -> (i32, i32) {
    %c0_i32 = arith.constant 0 : i32
    %c0_i32_0 = arith.constant 0 : i32
    %c0_i32_1 = arith.constant 0 : i32
    return %c0_i32, %c0_i32_0 : i32, i32
  }
  func.func @transform_3(%arg0: i32) -> (i32, i32) {
    %c0_i32 = arith.constant 0 : i32
    %c0_i32_0 = arith.constant 0 : i32
    return %arg0, %c0_i32 : i32, i32
  }
}

</mosaic_0001>

<bundles_post_ra>
// kernel: tpu_custom_call.1
= control target key start
LH: loop header
LB: loop body
LE: loop exit
PB: predicated region body
PF: predicated region fallthrough
CT: control target
= control target key end

     0   :  { %8 = vsyncpa [#allocation3], 0  ;;  %s723_s0 = inlined_call_operand.hbm [shape: f32[8,1024], index: 0, kind: input, shape index: {}]   ;;  %s724_s1 = inlined_call_operand.hbm [shape: f32[128,1024], index: 1, kind: input, shape index: {}]   ;;  %s725_s2 = inlined_call_operand.vmem [shape: f32[1,128], index: 2, kind: input, shape index: {}]   ;;  %s726_s3 = inlined_call_operand.vmem [shape: f32[8,4], index: 3, kind: output, shape index: {}]  }
   0x1   :  { %9 = vsyncpa [#allocation5], 0  ;;  %s662_s12 = smov [#allocation2]   ;;  %s663_s14 = smov [#allocation4]  }
   0x2   :  { %s16_s13 = sshll.u32 %s662_s12, 4  ;;  %s25_s15 = sshll.u32 %s663_s14, 4  ;;  %s17_s13 = int_to_ptr.vmem [resolvable:$true] %s16_s13  ;;  %s686_s15 = int_to_ptr.vmem [resolvable:$true] %s25_s15 }
   0x3   :  { %s614_s18 = scalar_lea.hbm %s723_s0, 1024 }
   0x4   :  { %p615_p0 = scmp.ne.s32.totalorder %s723_s0, %s614_s18  ;;  %p618_p1 = scmp.lt.u32.totalorder %s614_s18, %s723_s0 }
   0x6   :  { %p620_p2 = pnand %p618_p1, %p615_p0 }
   0x8   :  { %623 = shalt.err (!%p620_p2)
}
   0x9   :  { %s624_s23 = scalar_lea.vmem %s17_s13, 1024  ;;  %p629_p4 = scmp.lt.s32.totalorder %s17_s13, %s17_s13 }
   0xa   :  { %p625_p3 = scmp.ne.s32.totalorder %s17_s13, %s624_s23  ;;  %p630_p5 = scmp.lt.s32.totalorder %s624_s23, %s624_s23 }
   0xc   :  { %p631_p6 = por %p630_p5, %p629_p4 }
   0xe   :  { %p632_p7 = pnand %p631_p6, %p625_p3 }
  0x10   :  { %635 = shalt.err (!%p632_p7)
}
  0x11   :  { %19 = dma.hbm_to_vmem [thread:$0]  %s723_s0, 1024, %s17_s13, [#allocation3]  }
  0x12   :  { %s636_s28 = scalar_lea.hbm %s724_s1, 16384 }
  0x13   :  { %p637_p8 = scmp.ne.s32.totalorder %s724_s1, %s636_s28  ;;  %p640_p9 = scmp.lt.u32.totalorder %s636_s28, %s724_s1 }
  0x15   :  { %p642_p10 = pnand %p640_p9, %p637_p8 }
  0x17   :  { %645 = shalt.err (!%p642_p10)
}
  0x18   :  { %s646_s6 = scalar_lea.vmem %s686_s15, 16384  ;;  %p651_p12 = scmp.lt.s32.totalorder %s686_s15, %s686_s15 }
  0x19   :  { %p647_p11 = scmp.ne.s32.totalorder %s686_s15, %s646_s6  ;;  %p652_p13 = scmp.lt.s32.totalorder %s646_s6, %s646_s6 }
  0x1b   :  { %p653_p0 = por %p652_p13, %p651_p12 }
  0x1d   :  { %p654_p1 = pnand %p653_p0, %p647_p11 }
  0x1f   :  { %657 = shalt.err (!%p654_p1)
}
  0x20   :  { %s664_s0 = smov 1024   ;;  %s665_s7 = smov 64  }
  0x21   :  { %31 = dma.hbm_to_vmem [thread:$0]  %s724_s1, 16384, %s686_s15, [#allocation5], %s664_s0, %s664_s0, %s665_s7  }
  0x22   :  { %658 = dma.done.wait [#allocation3], 1024  }
  0x23   :  { %659 = vsyncadd [#allocation3], 4294966272 }
  0x24   :  { %660 = dma.done.wait [#allocation5], 16384  }
  0x25   :  { %661 = vsyncadd [#allocation5], 4294950912  ;;  %v49_v0 = vld [vmem:[#allocation4 + $0x8] sm:$0xff]  ;;  %v48_v5 = vld [vmem:[#allocation4] sm:$0xff]  ;;  %vm467_vm2 = vcmask 31744  }
  0x26   :  { %v57_v1 = vld [vmem:[#allocation4 + $0x48] sm:$0xff]  ;;  %v56_v6 = vld [vmem:[#allocation4 + $0x40] sm:$0xff] }
  0x27   :  { %v53_v2 = vld [vmem:[#allocation4 + $0x28] sm:$0xff]  ;;  %v476_v3 = vpack.c.bf16 %v57_v1, %v49_v0  ;;  %v478_v8 = vpack.c.bf16 %v56_v6, %v48_v5  ;;  %v52_v9 = vld [vmem:[#allocation4 + $0x20] sm:$0xff] }
  0x28   :  { %v61_v4 = vld [vmem:[#allocation4 + $0x68] sm:$0xff]  ;;  %v60_v10 = vld [vmem:[#allocation4 + $0x60] sm:$0xff] }
  0x29   :  { %v540_v7 = vpack.c.bf16 %v61_v4, %v53_v2  ;;  %v65_v11 = vld [vmem:[#allocation4 + $0x88] sm:$0xff]  ;;  %477 = vmatprep.subr.bf16.mxu1 %v476_v3  ;;  %v542_v12 = vpack.c.bf16 %v60_v10, %v52_v9  ;;  %v64_v18 = vld [vmem:[#allocation4 + $0x80] sm:$0xff] }
  0x2a   :  { %v73_v13 = vld [vmem:[#allocation4 + $0xc8] sm:$0xff]  ;;  %479 = vmatpush1.bf16.xpose.msra.mxu1 %v478_v8  ;;  %v72_v19 = vld [vmem:[#allocation4 + $0xc0] sm:$0xff] }
  0x2b   :  { %v69_v14 = vld [vmem:[#allocation4 + $0xa8] sm:$0xff]  ;;  %541 = vmatprep.subr.bf16.mxu0 %v540_v7  ;;  %v480_v16 = vpack.c.bf16 %v73_v13, %v65_v11  ;;  %v68_v20 = vld [vmem:[#allocation4 + $0xa0] sm:$0xff]  ;;  %v482_v26 = vpack.c.bf16 %v72_v19, %v64_v18 }
  0x2c   :  { %v77_v15 = vld [vmem:[#allocation4 + $0xe8] sm:$0xff]  ;;  %543 = vmatpush1.bf16.xpose.msra.mxu0 %v542_v12  ;;  %v76_v21 = vld [vmem:[#allocation4 + $0xe0] sm:$0xff] }
  0x2d   :  { %v544_v17 = vpack.c.bf16 %v77_v15, %v69_v14  ;;  %481 = vmatprep.subr.bf16.mxu1 %v480_v16  ;;  %v81_v22 = vld [vmem:[#allocation4 + $0x108] sm:$0xff]  ;;  %v546_v27 = vpack.c.bf16 %v76_v21, %v68_v20  ;;  %v80_v30 = vld [vmem:[#allocation4 + $0x100] sm:$0xff] }
  0x2e   :  { %v89_v23 = vld [vmem:[#allocation4 + $0x148] sm:$0xff]  ;;  %v88_v31 = vld [vmem:[#allocation4 + $0x140] sm:$0xff] }
  0x2f   :  { %545 = vmatprep.subr.bf16.mxu0 %v544_v17  ;;  %v85_v24 = vld [vmem:[#allocation4 + $0x128] sm:$0xff]  ;;  %v484_v28 = vpack.c.bf16 %v89_v23, %v81_v22  ;;  %v84_v32 = vld [vmem:[#allocation4 + $0x120] sm:$0xff]  ;;  %v486_v38 = vpack.c.bf16 %v88_v31, %v80_v30 }
  0x30   :  { %v93_v25 = vld [vmem:[#allocation4 + $0x168] sm:$0xff]  ;;  %v92_v33 = vld [vmem:[#allocation4 + $0x160] sm:$0xff] }
  0x31   :  { %v548_v29 = vpack.c.bf16 %v93_v25, %v85_v24  ;;  %v97_v34 = vld [vmem:[#allocation4 + $0x188] sm:$0xff]  ;;  %v550_v39 = vpack.c.bf16 %v92_v33, %v84_v32  ;;  %v96_v42 = vld [vmem:[#allocation4 + $0x180] sm:$0xff]  ;;  %v51_v32 = vld [vmem:[#allocation4 + $0x18] sm:$0xff] }
  0x32   :  { %483 = vmatpush1.bf16.xpose.msra.mxu1 %v482_v26  ;;  %v105_v35 = vld [vmem:[#allocation4 + $0x1c8] sm:$0xff]  ;;  %v104_v43 = vld [vmem:[#allocation4 + $0x1c0] sm:$0xff]  ;;  %v59_v33 = vld [vmem:[#allocation4 + $0x58] sm:$0xff] }
  0x33   :  { %485 = vmatprep.subr.bf16.mxu1 %v484_v28  ;;  %v101_v36 = vld [vmem:[#allocation4 + $0x1a8] sm:$0xff]  ;;  %v488_v40 = vpack.c.bf16 %v105_v35, %v97_v34  ;;  %v100_v44 = vld [vmem:[#allocation4 + $0x1a0] sm:$0xff]  ;;  %v490_v52 = vpack.c.bf16 %v104_v43, %v96_v42  ;;  %v55_v34 = vld [vmem:[#allocation4 + $0x38] sm:$0xff] }
  0x34   :  { %547 = vmatpush1.bf16.xpose.msra.mxu0 %v546_v27  ;;  %v109_v37 = vld [vmem:[#allocation4 + $0x1e8] sm:$0xff]  ;;  %v108_v45 = vld [vmem:[#allocation4 + $0x1e0] sm:$0xff]  ;;  %v63_v35 = vld [vmem:[#allocation4 + $0x78] sm:$0xff] }
  0x35   :  { %549 = vmatprep.subr.bf16.mxu0 %v548_v29  ;;  %v552_v41 = vpack.c.bf16 %v109_v37, %v101_v36  ;;  %v41_v46 = vld [vmem:[#allocation2 + $0x8] sm:$0xff]  ;;  %v554_v53 = vpack.c.bf16 %v108_v45, %v100_v44  ;;  %v112_v56 = vld [vmem:[#allocation4 + $0x200] sm:$0xff]  ;;  %v54_v42 = vld [vmem:[#allocation4 + $0x30] sm:$0xff] }
  0x36   :  { %v113_v47 = vld [vmem:[#allocation4 + $0x208] sm:$0xff]  ;;  %247 = vmatprep.mubr.f32.mxu1 %v41_v46  ;;  %v120_v57 = vld [vmem:[#allocation4 + $0x240] sm:$0xff]  ;;  %v62_v43 = vld [vmem:[#allocation4 + $0x70] sm:$0xff] }
  0x37   :  { %v121_v48 = vld [vmem:[#allocation4 + $0x248] sm:$0xff]  ;;  %v116_v58 = vld [vmem:[#allocation4 + $0x220] sm:$0xff]  ;;  %v494_v0 = vpack.c.bf16 %v120_v57, %v112_v56  ;;  %v67_v44 = vld [vmem:[#allocation4 + $0x98] sm:$0xff] }
  0x38   :  { %v45_v49 = vld [vmem:[#allocation2 + $0x28] sm:$0xff]  ;;  %v492_v54 = vpack.c.bf16 %v121_v48, %v113_v47  ;;  %v124_v59 = vld [vmem:[#allocation4 + $0x260] sm:$0xff]  ;;  %v75_v45 = vld [vmem:[#allocation4 + $0xd8] sm:$0xff] }
  0x39   :  { %v117_v50 = vld [vmem:[#allocation4 + $0x228] sm:$0xff]  ;;  %387 = vmatprep.mubr.f32.mxu0 %v45_v49  ;;  %v558_v1 = vpack.c.bf16 %v124_v59, %v116_v58  ;;  %v128_v4 = vld [vmem:[#allocation4 + $0x280] sm:$0xff]  ;;  %v71_v46 = vld [vmem:[#allocation4 + $0xb8] sm:$0xff] }
  0x3a   :  { %487 = vmatpush1.bf16.xpose.msra.mxu1 %v486_v38  ;;  %v125_v51 = vld [vmem:[#allocation4 + $0x268] sm:$0xff]  ;;  %v136_v5 = vld [vmem:[#allocation4 + $0x2c0] sm:$0xff]  ;;  %v508_v38 = vpack.c.bf16 %v59_v33, %v51_v32  ;;  %v79_v47 = vld [vmem:[#allocation4 + $0xf8] sm:$0xff] }
  0x3b   :  { %489 = vmatprep.subr.bf16.mxu1 %v488_v40  ;;  %v556_v55 = vpack.c.bf16 %v125_v51, %v117_v50  ;;  %v129_v60 = vld [vmem:[#allocation4 + $0x288] sm:$0xff]  ;;  %v132_v6 = vld [vmem:[#allocation4 + $0x2a0] sm:$0xff]  ;;  %v498_v12 = vpack.c.bf16 %v136_v5, %v128_v4  ;;  %v50_v40 = vld [vmem:[#allocation4 + $0x10] sm:$0xff]  ;;  %v574_v51 = vpack.c.bf16 %v62_v43, %v54_v42 }
  0x3c   :  { %551 = vmatpush1.bf16.xpose.msra.mxu0 %v550_v39  ;;  %v137_v61 = vld [vmem:[#allocation4 + $0x2c8] sm:$0xff]  ;;  %v140_v7 = vld [vmem:[#allocation4 + $0x2e0] sm:$0xff]  ;;  %v572_v39 = vpack.c.bf16 %v63_v35, %v55_v34  ;;  %v66_v56 = vld [vmem:[#allocation4 + $0x90] sm:$0xff] }
  0x3d   :  { %553 = vmatprep.subr.bf16.mxu0 %v552_v41  ;;  %v133_v62 = vld [vmem:[#allocation4 + $0x2a8] sm:$0xff]  ;;  %v496_v2 = vpack.c.bf16 %v137_v61, %v129_v60  ;;  %v562_v13 = vpack.c.bf16 %v140_v7, %v132_v6  ;;  %v144_v16 = vld [vmem:[#allocation4 + $0x300] sm:$0xff]  ;;  %v58_v41 = vld [vmem:[#allocation4 + $0x50] sm:$0xff] }
  0x3e   :  { %v141_v63 = vld [vmem:[#allocation4 + $0x2e8] sm:$0xff]  ;;  %v152_v17 = vld [vmem:[#allocation4 + $0x340] sm:$0xff]  ;;  %v510_v49 = vpack.c.bf16 %v58_v41, %v50_v40  ;;  %v74_v57 = vld [vmem:[#allocation4 + $0xd0] sm:$0xff] }
  0x3f   :  { %v560_v3 = vpack.c.bf16 %v141_v63, %v133_v62  ;;  %v145_v8 = vld [vmem:[#allocation4 + $0x308] sm:$0xff]  ;;  %v148_v18 = vld [vmem:[#allocation4 + $0x320] sm:$0xff]  ;;  %v502_v24 = vpack.c.bf16 %v152_v17, %v144_v16  ;;  %v70_v58 = vld [vmem:[#allocation4 + $0xb0] sm:$0xff] }
  0x40   :  { %v153_v9 = vld [vmem:[#allocation4 + $0x348] sm:$0xff]  ;;  %v156_v19 = vld [vmem:[#allocation4 + $0x360] sm:$0xff]  ;;  %v78_v59 = vld [vmem:[#allocation4 + $0xf0] sm:$0xff] }
  0x41   :  { %v149_v10 = vld [vmem:[#allocation4 + $0x328] sm:$0xff]  ;;  %v500_v14 = vpack.c.bf16 %v153_v9, %v145_v8  ;;  %v566_v25 = vpack.c.bf16 %v156_v19, %v148_v18  ;;  %v160_v28 = vld [vmem:[#allocation4 + $0x380] sm:$0xff]  ;;  %v83_v60 = vld [vmem:[#allocation4 + $0x118] sm:$0xff] }
  0x42   :  { %491 = vmatpush1.bf16.xpose.msra.mxu1 %v490_v52  ;;  %v157_v11 = vld [vmem:[#allocation4 + $0x368] sm:$0xff]  ;;  %v168_v29 = vld [vmem:[#allocation4 + $0x3c0] sm:$0xff]  ;;  %v512_v52 = vpack.c.bf16 %v75_v45, %v67_v44  ;;  %v91_v61 = vld [vmem:[#allocation4 + $0x158] sm:$0xff] }
  0x43   :  { %493 = vmatprep.subr.bf16.mxu1 %v492_v54  ;;  %v564_v15 = vpack.c.bf16 %v157_v11, %v149_v10  ;;  %v161_v20 = vld [vmem:[#allocation4 + $0x388] sm:$0xff]  ;;  %v164_v30 = vld [vmem:[#allocation4 + $0x3a0] sm:$0xff]  ;;  %v506_v36 = vpack.c.bf16 %v168_v29, %v160_v28  ;;  %v43_v54 = vld [vmem:[#allocation2 + $0x18] sm:$0xff] }
  0x44   :  { %555 = vmatpush1.bf16.xpose.msra.mxu0 %v554_v53  ;;  %v169_v21 = vld [vmem:[#allocation4 + $0x3c8] sm:$0xff]  ;;  %v172_v31 = vld [vmem:[#allocation4 + $0x3e0] sm:$0xff]  ;;  %v576_v53 = vpack.c.bf16 %v79_v47, %v71_v46  ;;  %v87_v62 = vld [vmem:[#allocation4 + $0x138] sm:$0xff] }
  0x45   :  { %557 = vmatprep.subr.bf16.mxu0 %v556_v55  ;;  %v165_v22 = vld [vmem:[#allocation4 + $0x3a8] sm:$0xff]  ;;  %v504_v26 = vpack.c.bf16 %v169_v21, %v161_v20  ;;  %v570_v37 = vpack.c.bf16 %v172_v31, %v164_v30  ;;  %v40_v48 = vld [vmem:[#allocation2] sm:$0xff]  ;;  %v47_v55 = vld [vmem:[#allocation2 + $0x38] sm:$0xff] }
  0x46   :  { %v173_v23 = vld [vmem:[#allocation4 + $0x3e8] sm:$0xff]  ;;  %v44_v50 = vld [vmem:[#allocation2 + $0x20] sm:$0xff]  ;;  %v95_v63 = vld [vmem:[#allocation4 + $0x178] sm:$0xff] }
  0x47   :  { %v568_v27 = vpack.c.bf16 %v173_v23, %v165_v22  ;;  %v82_v4 = vld [vmem:[#allocation4 + $0x110] sm:$0xff]  ;;  %v99_v8 = vld [vmem:[#allocation4 + $0x198] sm:$0xff] }
  0x48   :  { %v90_v5 = vld [vmem:[#allocation4 + $0x150] sm:$0xff]  ;;  %v107_v9 = vld [vmem:[#allocation4 + $0x1d8] sm:$0xff] }
  0x49   :  { %v86_v6 = vld [vmem:[#allocation4 + $0x130] sm:$0xff]  ;;  %v103_v10 = vld [vmem:[#allocation4 + $0x1b8] sm:$0xff] }
  0x4a   :  { %495 = vmatpush1.bf16.xpose.msra.mxu1 %v494_v0  ;;  %v514_v0 = vpack.c.bf16 %v74_v57, %v66_v56  ;;  %v94_v7 = vld [vmem:[#allocation4 + $0x170] sm:$0xff]  ;;  %v111_v11 = vld [vmem:[#allocation4 + $0x1f8] sm:$0xff] }
  0x4b   :  { %497 = vmatprep.subr.bf16.mxu1 %v496_v2  ;;  %v516_v2 = vpack.c.bf16 %v91_v61, %v83_v60  ;;  %v98_v16 = vld [vmem:[#allocation4 + $0x190] sm:$0xff]  ;;  %v115_v20 = vld [vmem:[#allocation4 + $0x218] sm:$0xff] }
  0x4c   :  { %559 = vmatpush1.bf16.xpose.msra.mxu0 %v558_v1  ;;  %v578_v1 = vpack.c.bf16 %v78_v59, %v70_v58  ;;  %v106_v17 = vld [vmem:[#allocation4 + $0x1d0] sm:$0xff]  ;;  %v123_v21 = vld [vmem:[#allocation4 + $0x258] sm:$0xff] }
  0x4d   :  { %561 = vmatprep.subr.bf16.mxu0 %v560_v3  ;;  %v580_v3 = vpack.c.bf16 %v95_v63, %v87_v62  ;;  %v102_v18 = vld [vmem:[#allocation4 + $0x1b0] sm:$0xff]  ;;  %v119_v22 = vld [vmem:[#allocation4 + $0x238] sm:$0xff] }
  0x4e   :  { %v110_v19 = vld [vmem:[#allocation4 + $0x1f0] sm:$0xff]  ;;  %v127_v23 = vld [vmem:[#allocation4 + $0x278] sm:$0xff] }
  0x4f   :  { %v114_v28 = vld [vmem:[#allocation4 + $0x210] sm:$0xff]  ;;  %v131_v32 = vld [vmem:[#allocation4 + $0x298] sm:$0xff] }
  0x50   :  { %v122_v29 = vld [vmem:[#allocation4 + $0x250] sm:$0xff]  ;;  %v139_v33 = vld [vmem:[#allocation4 + $0x2d8] sm:$0xff] }
  0x51   :  { %v118_v30 = vld [vmem:[#allocation4 + $0x230] sm:$0xff]  ;;  %v135_v34 = vld [vmem:[#allocation4 + $0x2b8] sm:$0xff] }
  0x52   :  { %499 = vmatpush1.bf16.xpose.msra.mxu1 %v498_v12  ;;  %v518_v12 = vpack.c.bf16 %v90_v5, %v82_v4  ;;  %v126_v31 = vld [vmem:[#allocation4 + $0x270] sm:$0xff]  ;;  %v143_v35 = vld [vmem:[#allocation4 + $0x2f8] sm:$0xff] }
  0x53   :  { %501 = vmatprep.subr.bf16.mxu1 %v500_v14  ;;  %v520_v14 = vpack.c.bf16 %v107_v9, %v99_v8  ;;  %v130_v40 = vld [vmem:[#allocation4 + $0x290] sm:$0xff]  ;;  %v147_v44 = vld [vmem:[#allocation4 + $0x318] sm:$0xff]  ;;  %v475_v8 = vld [vmem:[%s725_s2] ss:$0 sm:$0xff] }
  0x54   :  { %563 = vmatpush1.bf16.xpose.msra.mxu0 %v562_v13  ;;  %v582_v13 = vpack.c.bf16 %v94_v7, %v86_v6  ;;  %v138_v41 = vld [vmem:[#allocation4 + $0x2d0] sm:$0xff]  ;;  %v155_v45 = vld [vmem:[#allocation4 + $0x358] sm:$0xff] }
  0x55   :  { %565 = vmatprep.subr.bf16.mxu0 %v564_v15  ;;  %v584_v15 = vpack.c.bf16 %v111_v11, %v103_v10  ;;  %v134_v42 = vld [vmem:[#allocation4 + $0x2b0] sm:$0xff]  ;;  %v151_v46 = vld [vmem:[#allocation4 + $0x338] sm:$0xff] }
  0x56   :  { %v142_v43 = vld [vmem:[#allocation4 + $0x2f0] sm:$0xff]  ;;  %v159_v47 = vld [vmem:[#allocation4 + $0x378] sm:$0xff] }
  0x57   :  { %v163_v56 = vld [vmem:[#allocation4 + $0x398] sm:$0xff]  ;;  %v42_v6 = vld [vmem:[#allocation2 + $0x10] sm:$0xff] }
  0x58   :  { %v171_v57 = vld [vmem:[#allocation4 + $0x3d8] sm:$0xff]  ;;  %v46_v7 = vld [vmem:[#allocation2 + $0x30] sm:$0xff] }
  0x59   :  { %v167_v58 = vld [vmem:[#allocation4 + $0x3b8] sm:$0xff]  ;;  %v536_v62 = vpack.c.bf16 %v171_v57, %v163_v56 }
  0x5a   :  { %503 = vmatpush1.bf16.xpose.msra.mxu1 %v502_v24  ;;  %v522_v24 = vpack.c.bf16 %v106_v17, %v98_v16  ;;  %v175_v59 = vld [vmem:[#allocation4 + $0x3f8] sm:$0xff] }
  0x5b   :  { %505 = vmatprep.subr.bf16.mxu1 %v504_v26  ;;  %v524_v26 = vpack.c.bf16 %v123_v21, %v115_v20  ;;  %v600_v63 = vpack.c.bf16 %v175_v59, %v167_v58 }
  0x5c   :  { %567 = vmatpush1.bf16.xpose.msra.mxu0 %v566_v25  ;;  %v586_v25 = vpack.c.bf16 %v110_v19, %v102_v18 }
  0x5d   :  { %569 = vmatprep.subr.bf16.mxu0 %v568_v27  ;;  %v588_v27 = vpack.c.bf16 %v127_v23, %v119_v22 }
  0x62   :  { %507 = vmatpush1.bf16.xpose.msra.mxu1 %v506_v36  ;;  %v526_v36 = vpack.c.bf16 %v122_v29, %v114_v28 }
  0x63   :  { %509 = vmatprep.subr.bf16.mxu1 %v508_v38  ;;  %v528_v38 = vpack.c.bf16 %v139_v33, %v131_v32 }
  0x64   :  { %571 = vmatpush1.bf16.xpose.msra.mxu0 %v570_v37  ;;  %v590_v37 = vpack.c.bf16 %v126_v31, %v118_v30 }
  0x65   :  { %573 = vmatprep.subr.bf16.mxu0 %v572_v39  ;;  %v592_v39 = vpack.c.bf16 %v143_v35, %v135_v34 }
  0x69   :  { %248 = vmatmul.mubr.f32.vlgmr.msra.gmra.mrb[0].mxu1 %v40_v48  ;;  %v530_v48 = vpack.c.bf16 %v138_v41, %v130_v40 }
  0x6a   :  { %511 = vmatpush1.bf16.xpose.msra.mxu1 %v510_v49  ;;  %317 = vmatprep.mubr.f32.mxu1 %v43_v54  ;;  %v594_v49 = vpack.c.bf16 %v142_v43, %v134_v42  ;;  %v150_v54 = vld [vmem:[#allocation4 + $0x330] sm:$0xff] }
  0x6b   :  { %388 = vmatmul.mubr.f32.vlgmr.msra.gmra.mrb[0].mxu0 %v44_v50  ;;  %513 = vmatprep.subr.bf16.mxu1 %v512_v52  ;;  %v532_v50 = vpack.c.bf16 %v155_v45, %v147_v44  ;;  %v146_v52 = vld [vmem:[#allocation4 + $0x310] sm:$0xff] }
  0x6c   :  { %575 = vmatpush1.bf16.xpose.msra.mxu0 %v574_v51  ;;  %457 = vmatprep.mubr.f32.mxu0 %v47_v55  ;;  %v596_v51 = vpack.c.bf16 %v159_v47, %v151_v46  ;;  %v158_v55 = vld [vmem:[#allocation4 + $0x370] sm:$0xff] }
  0x6d   :  { %577 = vmatprep.subr.bf16.mxu0 %v576_v53  ;;  %v154_v53 = vld [vmem:[#allocation4 + $0x350] sm:$0xff]  ;;  %v598_v61 = vpack.c.bf16 %v158_v55, %v150_v54 }
  0x6e   :  { %v534_v60 = vpack.c.bf16 %v154_v53, %v146_v52 }
  0x72   :  { %515 = vmatpush1.bf16.xpose.msra.mxu1 %v514_v0  ;;  %v162_v0 = vld [vmem:[#allocation4 + $0x390] sm:$0xff] }
  0x73   :  { %517 = vmatprep.subr.bf16.mxu1 %v516_v2  ;;  %v166_v2 = vld [vmem:[#allocation4 + $0x3b0] sm:$0xff] }
  0x74   :  { %579 = vmatpush1.bf16.xpose.msra.mxu0 %v578_v1  ;;  %v170_v1 = vld [vmem:[#allocation4 + $0x3d0] sm:$0xff] }
  0x75   :  { %581 = vmatprep.subr.bf16.mxu0 %v580_v3  ;;  %v174_v3 = vld [vmem:[#allocation4 + $0x3f0] sm:$0xff]  ;;  %v538_v4 = vpack.c.bf16 %v170_v1, %v162_v0 }
  0x76   :  { %v602_v5 = vpack.c.bf16 %v174_v3, %v166_v2 }
  0x7a   :  { %519 = vmatpush1.bf16.xpose.msra.mxu1 %v518_v12 }
  0x7b   :  { %521 = vmatprep.subr.bf16.mxu1 %v520_v14 }
  0x7c   :  { %583 = vmatpush1.bf16.xpose.msra.mxu0 %v582_v13 }
  0x7d   :  { %585 = vmatprep.subr.bf16.mxu0 %v584_v15 }
  0x82   :  { %523 = vmatpush1.bf16.xpose.msra.mxu1 %v522_v24 }
  0x83   :  { %525 = vmatprep.subr.bf16.mxu1 %v524_v26 }
  0x84   :  { %587 = vmatpush1.bf16.xpose.msra.mxu0 %v586_v25 }
  0x85   :  { %589 = vmatprep.subr.bf16.mxu0 %v588_v27 }
  0x8a   :  { %527 = vmatpush1.bf16.xpose.msra.mxu1 %v526_v36 }
  0x8b   :  { %529 = vmatprep.subr.bf16.mxu1 %v528_v38 }
  0x8c   :  { %591 = vmatpush1.bf16.xpose.msra.mxu0 %v590_v37 }
  0x8d   :  { %593 = vmatprep.subr.bf16.mxu0 %v592_v39 }
  0x92   :  { %531 = vmatpush1.bf16.xpose.msra.mxu1 %v530_v48 }
  0x93   :  { %533 = vmatprep.subr.bf16.mxu1 %v532_v50 }
  0x94   :  { %595 = vmatpush1.bf16.xpose.msra.mxu0 %v594_v49 }
  0x95   :  { %597 = vmatprep.subr.bf16.mxu0 %v596_v51 }
  0x9a   :  { %535 = vmatpush1.bf16.xpose.msra.mxu1 %v534_v60 }
  0x9b   :  { %537 = vmatprep.subr.bf16.mxu1 %v536_v62 }
  0x9c   :  { %599 = vmatpush1.bf16.xpose.msra.mxu0 %v598_v61 }
  0x9d   :  { %601 = vmatprep.subr.bf16.mxu0 %v600_v63 }
  0xa2   :  { %539 = vmatpush1.bf16.xpose.msra.mxu1 %v538_v4 }
  0xa4   :  { %603 = vmatpush1.bf16.xpose.msra.mxu0 %v602_v5 }
  0xa9   :  { %318 = vmatmul.mubr.f32.vlgmr.msra.gmra.mrb[0].mxu1 %v42_v6 }
  0xab   :  { %458 = vmatmul.mubr.f32.vlgmr.msra.gmra.mrb[0].mxu0 %v46_v7 }
 0x17c   :  { %v319_v9 = vpop.f32.mrb[0].mxu1 }
 0x17d   :  { %v604_v10 = vadd.f32 %v475_v8, %v319_v9  ;;  %v321_v12 = vpop.f32.mrb[1].mxu1 }
 0x17e   :  { %v459_v11 = vpop.f32.mrb[0].mxu0 }
 0x17f   :  { %v461_v13 = vpop.f32.mrb[1].mxu0  ;;  %v605_v14 = vadd.f32 %v604_v10, %v459_v11 }
 0x181   :  { %vm463_vm0 = vcmp.gt.f32.partialorder %v605_v14, 0.0  ;;  %vm464_vm1 = vcmp.lt.f32.partialorder %v605_v14, 1.5 }
 0x182   :  { %vm465_vm3 = vmand %vm463_vm0, %vm464_vm1 }
 0x183   :  { %v466_v15 = vsel %vm465_vm3, %v605_v14, 0.0 }
 0x184   :  { %468 = vst.msk [vmem:[%s726_s3] sm:$0xff] %vm467_vm2, %v466_v15 }
 0x185   :  { %473 = vsyncpa [#allocation3], 1 }
 0x186   :  { %474 = vsyncpa [#allocation5], 1 }

</bundles_post_ra>
